<compile_context>
chip_gen: v6e
topology: v6e:2x2x1
jax: 0.10.0
libtpu: 0.0.40
codegen_flags: <defaults>
</compile_context>

<pallas_src>
import functools

import jax
import jax.numpy as jnp
from jax.experimental import pallas as pl
from jax.experimental.pallas import tpu as pltpu

INPUT_DIM = 1
OUTPUT_DIM = 1

LANES = 128                # TPU lane width (fast axis)
DEFAULT_TILE_ROWS = 4096   # 4096x128 f32 = 2 MiB/block; in+out double-buffered ~8 MiB


def affine_kernel(wb_ref, x_ref, o_ref):
    # wb_ref: (1, 2) SMEM f32 scalars = [weight[0, 0], bias[0]]
    # x_ref, o_ref: (tile_rows, 128) VMEM blocks (lane-dense view of the flat input)
    w = wb_ref[0, 0]
    b = wb_ref[0, 1]
    # VPU vmul + vadd in f32 (scalar broadcasts from sreg for free); cast only
    # on the store.  Full-width unmasked stores except on the ragged tail block.
    o_ref[...] = (x_ref[...].astype(jnp.float32) * w + b).astype(o_ref.dtype)


@functools.partial(jax.jit, static_argnames=("tile_rows",))
def linear_regression_forward(x, weight, bias, tile_rows=DEFAULT_TILE_ROWS):
    """x: (N, 1), weight: (1, 1), bias: (1,) -> (N, 1). Matches nn.Linear(1, 1)."""
    n, in_dim = x.shape
    out_dim = weight.shape[0]
    assert in_dim == 1 and out_dim == 1, "kernel specialized for Linear(1, 1)"

    dtype = x.dtype
    # Keep parameters in f32 so the compute matches PyTorch's f32 math.
    wb = jnp.concatenate(
        [weight.reshape(1, 1), bias.reshape(1, 1)], axis=1
    ).astype(jnp.float32)

    # Lane-dense layout: flatten (N, 1) -> (rows, 128).  This turns the
    # lane-width-1 layout (128x VMEM inflation + masked vst.msk stores) into
    # full-width tiles with unmasked stores and true N*4B DMA traffic.  Pad
    # only to the next multiple of 128 (skipped when already aligned); the
    # ragged last *block* is handled by Pallas' tail masking, not by padding.
    rows = pl.cdiv(n, LANES)
    total = rows * LANES
    flat = x.reshape(-1)
    padded = total != n
    if padded:
        flat = jnp.pad(flat, (0, total - n))
    x2d = flat.reshape(rows, LANES)

    # Tile rows: big (HBM-roofline) but never gratuitously larger than needed;
    # keep a multiple of 8 sublanes.
    tr = min(tile_rows, ((rows + 7) // 8) * 8)
    tr = max(8, ((tr + 7) // 8) * 8)

    grid = (pl.cdiv(rows, tr),)
    out2d = pl.pallas_call(
        affine_kernel,
        out_shape=jax.ShapeDtypeStruct((rows, LANES), dtype),
        grid_spec=pltpu.PrefetchScalarGridSpec(
            num_scalar_prefetch=0,
            grid=grid,
            in_specs=[
                # weight & bias: two scalars packed in one SMEM operand
                pl.BlockSpec(memory_space=pltpu.MemorySpace.SMEM),
                # x: tiled over rows -> BlockSpec double-buffered DMA pipeline
                pl.BlockSpec((tr, LANES), lambda i: (i, 0)),
            ],
            out_specs=pl.BlockSpec((tr, LANES), lambda i: (i, 0)),
        ),
        compiler_params=pltpu.CompilerParams(
            # Row tiles are independent -> shard across both TensorCores on v7x.
            # TODO(synk): if "parallel" does not engage both v7x TCs, switch this
            # axis to pltpu.CORE_PARALLEL.
            dimension_semantics=("parallel",),
            # Headroom for the larger tiles on every generation (<= physical VMEM
            # on v5e/v6e/v7x); default double-buffering only, no deeper pipelining.
            vmem_limit_bytes=32 * 1024 * 1024,
        ),
    )(wb, x2d)

    out_flat = out2d.reshape(-1)
    if padded:
        out_flat = out_flat[:n]
    return out_flat.reshape(n, out_dim)


if __name__ == "__main__":
    key = jax.random.PRNGKey(0)
    k_x, k_w, k_b, k_x2 = jax.random.split(key, 4)

    # Deterministic parameter init (mimics nn.Linear uniform(-1/sqrt(fan_in), +...))
    bound = 1.0 / (INPUT_DIM ** 0.5)
    weight = jax.random.uniform(k_w, (OUTPUT_DIM, INPUT_DIM), jnp.float32, -bound, bound)
    bias = jax.random.uniform(k_b, (OUTPUT_DIM,), jnp.float32, -bound, bound)

    # Small batch of scalar inputs, consistent with input_dim=1
    x = jax.random.normal(k_x, (8, INPUT_DIM), jnp.float32)
    out = linear_regression_forward(x, weight, bias)
    out = jax.block_until_ready(out)
    ref = x @ weight.T + bias
    assert out.shape == (8, OUTPUT_DIM)
    assert jnp.allclose(out, ref, atol=1e-5, rtol=1e-5)

    # Second small check that exercises the lane pad + ragged tail block path.
    x2 = jax.random.normal(k_x2, (300, INPUT_DIM), jnp.float32)
    out2 = jax.block_until_ready(linear_regression_forward(x2, weight, bias))
    ref2 = x2 @ weight.T + bias
    assert out2.shape == (300, OUTPUT_DIM)
    assert jnp.allclose(out2, ref2, atol=1e-5, rtol=1e-5)

    print("KERNEL_OK")
</pallas_src>

<mosaic_0001>
module attributes {stable_mosaic.version = 11 : i64} {
  func.func @affine_kernel(%arg0: i32, %arg1: memref<1x2xf32, #tpu.memory_space<smem>>, %arg2: memref<8x128xf32, #tpu.memory_space<vmem>>, %arg3: memref<8x128xf32, #tpu.memory_space<vmem>>) attributes {dimension_semantics = [#tpu.dimension_semantics<parallel>], iteration_bounds = array<i64: 1>, scalar_prefetch = 0 : i64, scratch_operands = 0 : i64, tpu.core_type = #tpu.core_type<tc>, window_params = [{transform_indices = @transform_0, window_bounds = array<i64: 1, 2>}, {transform_indices = @transform_1, window_bounds = array<i64: 8, 128>}, {transform_indices = @transform_2, window_bounds = array<i64: 8, 128>}]} {
    %c0 = arith.constant 0 : index
    %c0_0 = arith.constant 0 : index
    %0 = memref.load %arg1[%c0, %c0_0] : memref<1x2xf32, #tpu.memory_space<smem>>
    %c0_1 = arith.constant 0 : index
    %c1 = arith.constant 1 : index
    %1 = memref.load %arg1[%c0_1, %c1] : memref<1x2xf32, #tpu.memory_space<smem>>
    %c0_2 = arith.constant 0 : index
    %c0_3 = arith.constant 0 : index
    %2 = vector.load %arg2[%c0_2, %c0_3] : memref<8x128xf32, #tpu.memory_space<vmem>>, vector<8x128xf32>
    %3 = vector.broadcast %0 : f32 to vector<8x128xf32>
    %4 = arith.mulf %2, %3 : vector<8x128xf32>
    %5 = vector.broadcast %1 : f32 to vector<8x128xf32>
    %6 = arith.addf %4, %5 : vector<8x128xf32>
    %c0_4 = arith.constant 0 : index
    %c0_5 = arith.constant 0 : index
    %7 = vector.load %arg3[%c0_4, %c0_5] : memref<8x128xf32, #tpu.memory_space<vmem>>, vector<8x128xf32>
    tpu.vector_store %arg3[%c0_4, %c0_5], %6 {strides = array<i32>} : memref<8x128xf32, #tpu.memory_space<vmem>>, vector<8x128xf32>,
    return
  }
  func.func @transform_0(%arg0: i32) -> (i32, i32) {
    %c0_i32 = arith.constant 0 : i32
    %c0_i32_0 = arith.constant 0 : i32
    %c0_i32_1 = arith.constant 0 : i32
    return %c0_i32, %c0_i32_0 : i32, i32
  }
  func.func @transform_1(%arg0: i32) -> (i32, i32) {
    %c0_i32 = arith.constant 0 : i32
    %c0_i32_0 = arith.constant 0 : i32
    return %arg0, %c0_i32 : i32, i32
  }
  func.func @transform_2(%arg0: i32) -> (i32, i32) {
    %c0_i32 = arith.constant 0 : i32
    %c0_i32_0 = arith.constant 0 : i32
    return %arg0, %c0_i32 : i32, i32
  }
}

</mosaic_0001>

<bundles_post_ra>
// kernel: linear_regression_forward.1
= control target key start
LH: loop header
LB: loop body
LE: loop exit
PB: predicated region body
PF: predicated region fallthrough
CT: control target
= control target key end

     0   :  { %7 = vsyncpa [#allocation3], 0  ;;  %s115_s0 = inlined_call_operand.vmem [shape: f32[1,2], index: 0, kind: input, shape index: {}]   ;;  %s116_s1 = inlined_call_operand.vmem [shape: f32[1,128], index: 1, kind: input, shape index: {}]   ;;  %s117_s2 = inlined_call_operand.vmem [shape: f32[1,128], index: 2, kind: output, shape index: {}]  }
   0x1   :  { %s14_s11 = sshll.u32 %s115_s0, 4  ;;  %s15_s11 = int_to_ptr.vmem [resolvable:$true] %s14_s11 }
   0x2   :  { %s76_s12 = scalar_lea.vmem %s15_s11, 16  ;;  %p81_p1 = scmp.lt.s32.totalorder %s15_s11, %s15_s11 }
   0x3   :  { %p77_p0 = scmp.ne.s32.totalorder %s15_s11, %s76_s12  ;;  %p82_p2 = scmp.lt.s32.totalorder %s76_s12, %s76_s12 }
   0x5   :  { %p83_p3 = por %p82_p2, %p81_p1 }
   0x7   :  { %p84_p4 = pnand %p83_p3, %p77_p0 }
   0x9   :  { %87 = shalt.err (!%p84_p4)
}
   0xa   :  { %s90_s13 = smov [#allocation2]  }
   0xb   :  { %17 = dma.vmem_to_smem %s15_s11, 16, %s90_s13, [#allocation3]  }
   0xc   :  { %88 = dma.done.wait [#allocation3], 16  }
   0xd   :  { %89 = vsyncadd [#allocation3], 4294967280 }
   0xe   :  { %23 = sfence }
   0xf   :  { %s24_s14 = sld [smem:[#allocation2]]  ;;  %v26_v0 = vld [vmem:[%s116_s1] sm:$0xff] }
  0x10   :  { %s74_s15 = sld [smem:[#allocation2 + $0x1]] }
  0x15   :  { %v27_v1 = vstv %s24_s14 }
  0x16   :  { %v28_v2 = vmul.f32 %v27_v1, %v26_v0  ;;  %v29_v3 = vstv %s74_s15 }
  0x18   :  { %v30_v4 = vadd.f32 %v29_v3, %v28_v2 }
  0x1a   :  { %31 = vst [vmem:[#allocation4] sm:$0xff] %v30_v4 }
  0x21   :  { %v50_v5 = vld [vmem:[#allocation4] sm:$0x1] }
  0x22   :  { %51 = vst [vmem:[%s117_s2] sm:$0x1] %v50_v5 }
  0x23   :  { %69 = vsyncpa [#allocation3], 1 }

</bundles_post_ra>
